<compile_context>
chip_gen: v7x
topology: tpu7x:2x2x1
jax: 0.10.0
libtpu: 0.0.40
codegen_flags: <defaults>
</compile_context>

<pallas_src>
import functools

import jax
import jax.numpy as jnp
from jax import lax
from jax.experimental import pallas as pl
from jax.experimental.pallas import tpu as pltpu


def _contrastive_loss_kernel(tgt_ref, x_ref, loss_ref, m_s, s_s, xt_s, *,
                             c_total, tile_c, num_c_blocks):
    # tgt_ref: (1,) int32 in SMEM (scalar prefetch)
    # x_ref:   (TILE_B, TILE_C) logits in VMEM
    # loss_ref:(TILE_B, 1) f32 output (written on the last class block)
    # m_s/s_s/xt_s: (TILE_B, 1) f32 running max / running sum / x[:, t]
    k = pl.program_id(1)
    t = tgt_ref[0]

    @pl.when(k == 0)
    def _init():
        m_s[...] = jnp.full_like(m_s, jnp.finfo(jnp.float32).min)
        s_s[...] = jnp.zeros_like(s_s)
        xt_s[...] = jnp.zeros_like(xt_s)

    x = x_ref[...]                                                  # input dtype
    # global class index of each lane in this block (tiny (1, TILE_C) row)
    col = lax.broadcasted_iota(jnp.int32, (1, tile_c), 1) + k * tile_c

    if num_c_blocks * tile_c != c_total:   # static: ragged last class block
        neg = jnp.asarray(float(jnp.finfo(x.dtype).min), dtype=x.dtype)
        x = jnp.where(col < c_total, x, neg)

    # Block max in the input dtype (exact), f32 cast folded into the exp pass.
    bm = jnp.max(x, axis=1, keepdims=True).astype(jnp.float32)      # (TILE_B, 1)
    m_prev = m_s[...]
    m_new = jnp.maximum(m_prev, bm)

    p_sum = jnp.sum(jnp.exp(x.astype(jnp.float32) - m_new),
                    axis=1, keepdims=True)                          # (TILE_B, 1)
    s_s[...] = s_s[...] * jnp.exp(m_prev - m_new) + p_sum
    m_s[...] = m_new

    # x[:, t] via lane mask; reduce in input dtype (exact: one nonzero per row).
    zero = jnp.zeros((), dtype=x.dtype)
    xt_s[...] += jnp.sum(jnp.where(col == t, x, zero),
                         axis=1, keepdims=True).astype(jnp.float32)

    @pl.when(k == num_c_blocks - 1)
    def _finalize():
        # -log(exp(x_t) / sum exp(x)) == logsumexp(x) - x_t
        loss_ref[...] = (m_s[...] + jnp.log(s_s[...])) - xt_s[...]


def _round_up(n, m):
    return ((n + m - 1) // m) * m


def _sublane_multiple(itemsize):
    # f32 -> 8, bf16/f16 -> 16, int8/fp8 -> 32 (packed sublane tiling minima)
    return max(8, 32 // itemsize)


def _vmem_budget_bytes():
    """(per-step footprint budget, vmem_limit_bytes), generation aware."""
    try:
        cap = int(pltpu.get_tpu_info().vmem_capacity_bytes)
    except Exception:
        cap = 64 << 20                      # conservative: v7x per-TC physical
    if cap >= (100 << 20):                  # v5e / v6e: 128 MiB physical
        return 48 << 20, 64 << 20
    # v7x (64 MiB / TC) or unknown: keep double-buffering alive with headroom
    return 28 << 20, 44 << 20


def _choose_tiles(b, c, itemsize, budget, sub):
    """Pick (TILE_B, TILE_C) from a per-step byte budget.

    Footprint model per grid step: 2 double-buffered input tiles plus ~3 f32
    full-tile temporaries (exp / select intermediates); outputs + scratch are
    negligible (TILE_B x 1 columns)."""
    per_row_full = (2 * itemsize + 3 * 4) * c
    max_rows_full = max(sub, budget // per_row_full)
    if b <= max_rows_full:
        return _round_up(b, sub), c                     # whole batch, full C
    if max_rows_full >= 1024 or c <= 512:
        tile_b = min((max_rows_full // sub) * sub, 16384, _round_up(b, sub))
        return max(sub, tile_b), c
    # Very large C: tile the class axis too (online logsumexp in the kernel).
    tile_b = min(_round_up(b, sub), 1024)
    per_elem = 2 * itemsize + 3 * 4
    tile_c = max(128, (budget // (tile_b * per_elem)) // 128 * 128)
    if tile_c >= c:
        return tile_b, c
    return tile_b, tile_c


def contrastive_loss(output, target, *, tile_b=None, tile_c=None):
    """output: (B, C) float array (f32 or bf16); target: scalar int class index.
    Returns the per-sample loss of shape (B,), matching the PyTorch module."""
    b, c = output.shape
    itemsize = output.dtype.itemsize
    sub = _sublane_multiple(itemsize)
    budget, vmem_limit = _vmem_budget_bytes()

    auto_b, auto_c = _choose_tiles(b, c, itemsize, budget, sub)
    if tile_b is None:
        tile_b = auto_b
    else:
        assert tile_b % sub == 0, (
            f"tile_b must be a multiple of {sub} for dtype {output.dtype}")
    if tile_c is None:
        tile_c = auto_c
    else:
        assert tile_c == c or tile_c % 128 == 0, (
            "tile_c must equal C or be a multiple of 128")

    num_b = pl.cdiv(b, tile_b)          # no jnp.pad: partial blocks are handled
    num_c = pl.cdiv(c, tile_c)

    tgt = jnp.asarray(target, dtype=jnp.int32).reshape((1,))

    kernel = functools.partial(
        _contrastive_loss_kernel,
        c_total=c, tile_c=tile_c, num_c_blocks=num_c)

    cost = pl.CostEstimate(
        flops=5 * b * c,
        transcendentals=b * c,
        bytes_accessed=b * c * itemsize + 4 * b + 4,
    )

    out = pl.pallas_call(
        kernel,
        out_shape=jax.ShapeDtypeStruct((b, 1), jnp.float32),
        grid_spec=pltpu.PrefetchScalarGridSpec(
            num_scalar_prefetch=1,
            grid=(num_b, num_c),                     # reduction (class) axis last
            in_specs=[pl.BlockSpec((tile_b, tile_c),
                                   lambda i, k, tgt_ref: (i, k))],
            out_specs=pl.BlockSpec((tile_b, 1),
                                   lambda i, k, tgt_ref: (i, 0)),
            scratch_shapes=[pltpu.VMEM((tile_b, 1), jnp.float32)] * 3,
        ),
        compiler_params=pltpu.CompilerParams(
            # batch tiles independent -> megacore-shardable on v7x;
            # class axis is an accumulated reduction -> "arbitrary"
            dimension_semantics=("parallel", "arbitrary"),
            vmem_limit_bytes=vmem_limit,
        ),
        cost_estimate=cost,
    )(tgt, output)
    return out[:, 0]


if __name__ == "__main__":
    root = jax.random.PRNGKey(0)
    k1, k2, k3, k4 = jax.random.split(root, 4)

    def ref_loss(x, t):
        upper = jnp.exp(x[:, t])
        lower = jnp.exp(x).sum(1)
        return -jnp.log(upper / lower)

    # 1) small shapes consistent with the module: batch=8, classes=16
    B, C = 8, 16
    x = jax.random.normal(k1, (B, C), dtype=jnp.float32)
    loss = jax.block_until_ready(contrastive_loss(x, 3))
    assert loss.shape == (B,)
    assert jnp.allclose(loss, ref_loss(x, 3), atol=1e-5, rtol=1e-5)

    # 2) un-padded partial last batch block + multi-tile pipeline (B not % tile_b)
    B2, C2 = 37, 16
    x2 = jax.random.normal(k2, (B2, C2), dtype=jnp.float32)
    loss2 = jax.block_until_ready(contrastive_loss(x2, 5, tile_b=8))
    assert loss2.shape == (B2,)
    assert jnp.allclose(loss2, ref_loss(x2, 5), atol=1e-5, rtol=1e-5)

    # 3) class-tiled online-logsumexp path with a ragged last class block
    B3, C3 = 16, 200
    x3 = jax.random.normal(k3, (B3, C3), dtype=jnp.float32)
    loss3 = jax.block_until_ready(contrastive_loss(x3, 131, tile_b=8, tile_c=128))
    assert jnp.allclose(loss3, ref_loss(x3, 131), atol=1e-5, rtol=1e-5)

    # 4) bf16 logits: dtype-aware sublane rounding (TILE_B multiple of 16)
    B4, C4 = 10, 32
    x4 = jax.random.normal(k4, (B4, C4), dtype=jnp.float32).astype(jnp.bfloat16)
    loss4 = jax.block_until_ready(contrastive_loss(x4, 7))
    assert jnp.allclose(loss4, ref_loss(x4.astype(jnp.float32), 7),
                        atol=1e-3, rtol=1e-3)

    print("KERNEL_OK")
</pallas_src>

<mosaic_0001>
module attributes {stable_mosaic.version = 11 : i64} {
  func.func @_contrastive_loss_kernel(%arg0: i32, %arg1: i32, %arg2: memref<1xi32, #tpu.memory_space<smem>>, %arg3: memref<8x16xf32, #tpu.memory_space<vmem>>, %arg4: memref<8x1xf32, #tpu.memory_space<vmem>>, %arg5: memref<8x1xf32, #tpu.memory_space<vmem>>, %arg6: memref<8x1xf32, #tpu.memory_space<vmem>>, %arg7: memref<8x1xf32, #tpu.memory_space<vmem>>) attributes {dimension_semantics = [#tpu.dimension_semantics<parallel>, #tpu.dimension_semantics<arbitrary>], iteration_bounds = array<i64: 1, 1>, scalar_prefetch = 1 : i64, scratch_operands = 3 : i64, tpu.core_type = #tpu.core_type<tc>, window_params = [{transform_indices = @transform_0, window_bounds = array<i64: 8, 16>}, {transform_indices = @transform_1, window_bounds = array<i64: 8, 1>}]} {
    %c0 = arith.constant 0 : index
    %0 = memref.load %arg2[%c0] : memref<1xi32, #tpu.memory_space<smem>>
    %c0_i32 = arith.constant 0 : i32
    %1 = arith.cmpi eq, %arg1, %c0_i32 : i32
    %2 = arith.extui %1 : i1 to i32
    %c0_i32_0 = arith.constant 0 : i32
    %3 = arith.cmpi ne, %2, %c0_i32_0 : i32
    scf.if %3 {
      %cst_20 = arith.constant -3.40282347E+38 : f32
      %39 = vector.broadcast %cst_20 : f32 to vector<8x1xf32>
      %c0_21 = arith.constant 0 : index
      %c0_22 = arith.constant 0 : index
      %40 = vector.load %arg5[%c0_21, %c0_22] : memref<8x1xf32, #tpu.memory_space<vmem>>, vector<8x1xf32>
      tpu.vector_store %arg5[%c0_21, %c0_22], %39 {strides = array<i32>} : memref<8x1xf32, #tpu.memory_space<vmem>>, vector<8x1xf32>,
      %cst_23 = arith.constant 0.000000e+00 : f32
      %41 = vector.broadcast %cst_23 : f32 to vector<8x1xf32>
      %c0_24 = arith.constant 0 : index
      %c0_25 = arith.constant 0 : index
      %42 = vector.load %arg6[%c0_24, %c0_25] : memref<8x1xf32, #tpu.memory_space<vmem>>, vector<8x1xf32>
      tpu.vector_store %arg6[%c0_24, %c0_25], %41 {strides = array<i32>} : memref<8x1xf32, #tpu.memory_space<vmem>>, vector<8x1xf32>,
      %cst_26 = arith.constant 0.000000e+00 : f32
      %43 = vector.broadcast %cst_26 : f32 to vector<8x1xf32>
      %c0_27 = arith.constant 0 : index
      %c0_28 = arith.constant 0 : index
      %44 = vector.load %arg7[%c0_27, %c0_28] : memref<8x1xf32, #tpu.memory_space<vmem>>, vector<8x1xf32>
      tpu.vector_store %arg7[%c0_27, %c0_28], %43 {strides = array<i32>} : memref<8x1xf32, #tpu.memory_space<vmem>>, vector<8x1xf32>,
    } else {
    }
    %c0_1 = arith.constant 0 : index
    %c0_2 = arith.constant 0 : index
    %4 = vector.load %arg3[%c0_1, %c0_2] : memref<8x16xf32, #tpu.memory_space<vmem>>, vector<8x16xf32>
    %5 = tpu.iota {dimensions = array<i32: 1>} : vector<1x16xi32>
    %c16_i32 = arith.constant 16 : i32
    %6 = arith.muli %arg1, %c16_i32 : i32
    %7 = vector.broadcast %6 : i32 to vector<1x16xi32>
    %8 = arith.addi %5, %7 : vector<1x16xi32>
    %cst = arith.constant dense<0xFF800000> : vector<8xf32>
    %9 = vector.multi_reduction <maximumf>, %4, %cst [1] : vector<8x16xf32> to vector<8xf32>
    %10 = vector.shape_cast %9 : vector<8xf32> to vector<8x1xf32>
    %c0_3 = arith.constant 0 : index
    %c0_4 = arith.constant 0 : index
    %11 = vector.load %arg5[%c0_3, %c0_4] : memref<8x1xf32, #tpu.memory_space<vmem>>, vector<8x1xf32>
    %12 = arith.maximumf %11, %10 : vector<8x1xf32>
    %13 = vector.broadcast %12 : vector<8x1xf32> to vector<8x16xf32>
    %14 = arith.subf %4, %13 : vector<8x16xf32>
    %15 = math.exp %14 : vector<8x16xf32>
    %cst_5 = arith.constant dense<0.000000e+00> : vector<8xf32>
    %16 = vector.multi_reduction <add>, %15, %cst_5 [1] : vector<8x16xf32> to vector<8xf32>
    %17 = vector.shape_cast %16 : vector<8xf32> to vector<8x1xf32>
    %c0_6 = arith.constant 0 : index
    %c0_7 = arith.constant 0 : index
    %18 = vector.load %arg6[%c0_6, %c0_7] : memref<8x1xf32, #tpu.memory_space<vmem>>, vector<8x1xf32>
    %19 = arith.subf %11, %12 : vector<8x1xf32>
    %20 = math.exp %19 : vector<8x1xf32>
    %21 = arith.mulf %18, %20 : vector<8x1xf32>
    %22 = arith.addf %21, %17 : vector<8x1xf32>
    %c0_8 = arith.constant 0 : index
    %c0_9 = arith.constant 0 : index
    %23 = vector.load %arg6[%c0_8, %c0_9] : memref<8x1xf32, #tpu.memory_space<vmem>>, vector<8x1xf32>
    tpu.vector_store %arg6[%c0_8, %c0_9], %22 {strides = array<i32>} : memref<8x1xf32, #tpu.memory_space<vmem>>, vector<8x1xf32>,
    %c0_10 = arith.constant 0 : index
    %c0_11 = arith.constant 0 : index
    %24 = vector.load %arg5[%c0_10, %c0_11] : memref<8x1xf32, #tpu.memory_space<vmem>>, vector<8x1xf32>
    tpu.vector_store %arg5[%c0_10, %c0_11], %12 {strides = array<i32>} : memref<8x1xf32, #tpu.memory_space<vmem>>, vector<8x1xf32>,
    %c0_12 = arith.constant 0 : index
    %c0_13 = arith.constant 0 : index
    %25 = vector.load %arg7[%c0_12, %c0_13] : memref<8x1xf32, #tpu.memory_space<vmem>>, vector<8x1xf32>
    %26 = vector.broadcast %0 : i32 to vector<1x16xi32>
    %27 = arith.cmpi eq, %8, %26 : vector<1x16xi32>
    %cst_14 = arith.constant 0.000000e+00 : f32
    %28 = vector.shape_cast %27 : vector<1x16xi1> to vector<1x16xi1>
    %29 = vector.broadcast %28 : vector<1x16xi1> to vector<8x16xi1>
    %30 = vector.broadcast %cst_14 : f32 to vector<8x16xf32>
    %31 = arith.select %29, %4, %30 : vector<8x16xi1>, vector<8x16xf32>
    %cst_15 = arith.constant dense<0.000000e+00> : vector<8xf32>
    %32 = vector.multi_reduction <add>, %31, %cst_15 [1] : vector<8x16xf32> to vector<8xf32>
    %33 = vector.shape_cast %32 : vector<8xf32> to vector<8x1xf32>
    %34 = arith.addf %25, %33 : vector<8x1xf32>
    %c0_16 = arith.constant 0 : index
    %c0_17 = arith.constant 0 : index
    %35 = vector.load %arg7[%c0_16, %c0_17] : memref<8x1xf32, #tpu.memory_space<vmem>>, vector<8x1xf32>
    tpu.vector_store %arg7[%c0_16, %c0_17], %34 {strides = array<i32>} : memref<8x1xf32, #tpu.memory_space<vmem>>, vector<8x1xf32>,
    %c0_i32_18 = arith.constant 0 : i32
    %36 = arith.cmpi eq, %arg1, %c0_i32_18 : i32
    %37 = arith.extui %36 : i1 to i32
    %c0_i32_19 = arith.constant 0 : i32
    %38 = arith.cmpi ne, %37, %c0_i32_19 : i32
    scf.if %38 {
      %c0_20 = arith.constant 0 : index
      %c0_21 = arith.constant 0 : index
      %39 = vector.load %arg5[%c0_20, %c0_21] : memref<8x1xf32, #tpu.memory_space<vmem>>, vector<8x1xf32>
      %c0_22 = arith.constant 0 : index
      %c0_23 = arith.constant 0 : index
      %40 = vector.load %arg6[%c0_22, %c0_23] : memref<8x1xf32, #tpu.memory_space<vmem>>, vector<8x1xf32>
      %41 = math.log %40 : vector<8x1xf32>
      %42 = arith.addf %39, %41 : vector<8x1xf32>
      %c0_24 = arith.constant 0 : index
      %c0_25 = arith.constant 0 : index
      %43 = vector.load %arg7[%c0_24, %c0_25] : memref<8x1xf32, #tpu.memory_space<vmem>>, vector<8x1xf32>
      %44 = arith.subf %42, %43 : vector<8x1xf32>
      %c0_26 = arith.constant 0 : index
      %c0_27 = arith.constant 0 : index
      %45 = vector.load %arg4[%c0_26, %c0_27] : memref<8x1xf32, #tpu.memory_space<vmem>>, vector<8x1xf32>
      tpu.vector_store %arg4[%c0_26, %c0_27], %44 {strides = array<i32>} : memref<8x1xf32, #tpu.memory_space<vmem>>, vector<8x1xf32>,
    } else {
    }
    return
  }
  func.func @transform_0(%arg0: i32, %arg1: i32, %arg2: memref<1xi32, #tpu.memory_space<smem>>) -> (i32, i32) {
    %c0_i32 = arith.constant 0 : i32
    return %arg0, %arg1 : i32, i32
  }
  func.func @transform_1(%arg0: i32, %arg1: i32, %arg2: memref<1xi32, #tpu.memory_space<smem>>) -> (i32, i32) {
    %c0_i32 = arith.constant 0 : i32
    %c0_i32_0 = arith.constant 0 : i32
    return %arg0, %c0_i32 : i32, i32
  }
}

</mosaic_0001>

<bundles_post_ra>
// kernel: tpu_custom_call.1
= control target key start
LH: loop header
LB: loop body
LE: loop exit
PB: predicated region body
PF: predicated region fallthrough
CT: control target
= control target key end

     0   :  { %8 = vsyncpa [#allocation8], 0  ;;  %s125_s9 = smov [#allocation7]   ;;  %s172_s0 = inlined_call_operand.<no memory space> [shape: s32[1], index: 0, kind: input, shape index: {}]   ;;  %s173_s1 = inlined_call_operand.hbm [shape: f32[8,16], index: 1, kind: input, shape index: {}]   ;;  %s174_s2 = inlined_call_operand.vmem [shape: f32[8,1], index: 2, kind: output, shape index: {}]  }
   0x1   :  { %s15_s10 = sshll.u32 %s125_s9, 4  ;;  %s101_s13 = scalar_lea.hbm %s173_s1, 128  ;;  %s16_s10 = int_to_ptr.vmem [resolvable:$true] %s15_s10 }
   0x2   :  { %p102_p0 = scmp.ne.s32.totalorder %s173_s1, %s101_s13  ;;  %p105_p1 = scmp.lt.u32.totalorder %s101_s13, %s173_s1 }
   0x4   :  { %p107_p2 = pnand %p105_p1, %p102_p0 }
   0x6   :  { %110 = shalt.err (!%p107_p2)
}
   0x7   :  { %s111_s18 = scalar_lea.vmem %s16_s10, 128  ;;  %p116_p4 = scmp.lt.s32.totalorder %s16_s10, %s16_s10 }
   0x8   :  { %p112_p3 = scmp.ne.s32.totalorder %s16_s10, %s111_s18  ;;  %p117_p5 = scmp.lt.s32.totalorder %s111_s18, %s111_s18 }
   0xa   :  { %p118_p6 = por %p117_p5, %p116_p4 }
   0xc   :  { %p119_p7 = pnand %p118_p6, %p112_p3 }
   0xe   :  { %122 = shalt.err (!%p119_p7)
}
   0xf   :  { %18 = dma.hbm_to_vmem [thread:$0]  %s173_s1, 128, %s16_s10, [#allocation8]  }
  0x10   :  { %123 = dma.done.wait [#allocation8], 128  }
  0x11   :  { %124 = vsyncadd [#allocation8], 4294967168  ;;  %vm27_vm0 = vcmask 7168   ;;  %v126_v0 = vmov -3.4028235e+38   ;;  %vm37_vm1 = vcmask 130048   ;;  %v32_v12 = vlaneseq }
  0x12   :  { %28 = vst.msk [vmem:[#allocation2] sm:$0xff] %vm27_vm0, %v126_v0  ;;  %v31_v1 = vld [vmem:[#allocation7] sm:$0xff]  ;;  %v127_v3 = vmov 0   ;;  %v128_v4 = vmov 0.0   ;;  %v64_v14 = vstv %s172_s0 }
  0x13   :  { %v38_v2 = vsel %vm37_vm1, %v31_v1, -inf  ;;  %94 = vset.pattern.permute.xlu0 %v127_v3  ;;  %29 = vst.msk [vmem:[#allocation3] sm:$0xff] %vm27_vm0, %v128_v4  ;;  %30 = vst.msk [vmem:[#allocation4] sm:$0xff] %vm27_vm0, %v128_v4  ;;  %v33_v13 = vand.u32 127, %v32_v12 }
  0x14   :  { %39 = vmax.xlane.f32.xlu0 %v38_v2 }
  0x15   :  { %vm65_vm2 = vcmp.eq.s32.totalorder %v33_v13, %v64_v14 }
  0x16   :  { %v68_v16 = vsel %vm65_vm2, %v31_v1, 0.0 }
  0x17   :  { %v69_v18 = vsel %vm37_vm1, %v68_v16, 0.0 }
  0x19   :  { %v41_v5 = vld [vmem:[#allocation2] sm:$0xff] }
  0x1a   :  { %v54_v21 = vld [vmem:[#allocation3] sm:$0xff]  ;;  %v63_v25 = vld [vmem:[#allocation4] sm:$0xff] }
  0xa1   :  { %v40_v6 = vpop.xlane.xlu0 %39 }
  0xa2   :  { %v42_v7 = vmax.f32 %v41_v5, %v40_v6 }
  0xa4   :  { %v55_v8 = vsub.f32 %v41_v5, %v42_v7  ;;  %62 = vst.msk [vmem:[#allocation2] sm:$0xff] %vm27_vm0, %v42_v7  ;;  %45 = vperm.xlu0 %94, %v42_v7  }
  0xa6   :  { %v56_v19 = vmul.f32 1.442695, %v55_v8 }
  0xab   :  { %v77_v31 = vld [vmem:[#allocation2] sm:$0xff] }
 0x123   :  { %v46_v9 = vpop.permute.xlu0 %45 }
 0x124   :  { %v48_v10 = vsub.f32 %v31_v1, %v46_v9 }
 0x126   :  { %v49_v11 = vmul.f32 1.442695, %v48_v10 }
 0x128   :  { %95 = vpow2.f32 %v49_v11 }
 0x129   :  { %97 = vpow2.f32 %v56_v19 }
 0x132   :  { %v96_v15 = vpop.eup %95 }
 0x133   :  { %v51_v17 = vsel %vm37_vm1, %v96_v15, 0.0  ;;  %v98_v20 = vpop.eup %97 }
 0x134   :  { %52 = vadd.xlane.f32.xlu1 %v51_v17  ;;  %v58_v22 = vmul.f32 %v98_v20, %v54_v21 }
 0x138   :  { %70 = vadd.xlane.f32.xlu1 %v69_v18 }
 0x1c1   :  { %v53_v23 = vpop.xlane.xlu1 %52 }
 0x1c2   :  { %v59_v24 = vadd.f32 %v58_v22, %v53_v23 }
 0x1c4   :  { %61 = vst.msk [vmem:[#allocation3] sm:$0xff] %vm27_vm0, %v59_v24 }
 0x1c5   :  { %v71_v26 = vpop.xlane.xlu1 %70 }
 0x1c6   :  { %v72_v27 = vadd.f32 %v71_v26, %v63_v25 }
 0x1c8   :  { %73 = vst.msk [vmem:[#allocation4] sm:$0xff] %vm27_vm0, %v72_v27 }
 0x1cb   :  { %v78_v28 = vld [vmem:[#allocation3] sm:$0xff] }
 0x1cc   :  { %99 = vlog2.f32 %v78_v28 }
 0x1cf   :  { %v82_v32 = vld [vmem:[#allocation4] sm:$0xff] }
 0x1d6   :  { %v100_v29 = vpop.eup %99 }
 0x1d7   :  { %v80_v30 = vmul.f32 0.6931472, %v100_v29 }
 0x1d9   :  { %v81_v33 = vadd.f32 %v80_v30, %v77_v31 }
 0x1db   :  { %v83_v34 = vsub.f32 %v81_v33, %v82_v32 }
 0x1dd   :  { %84 = vst.msk [vmem:[%s174_s2] sm:$0xff] %vm27_vm0, %v83_v34 }
 0x1de   :  { %89 = vsyncpa [#allocation8], 1 }

</bundles_post_ra>
